<compile_context>
chip_gen: v7x
topology: tpu7x:2x2x1
jax: 0.10.0
libtpu: 0.0.40
codegen_flags: <defaults>
</compile_context>

<pallas_src>
import jax
import jax.numpy as jnp
from jax.experimental import pallas as pl
from jax.experimental.pallas import tpu as pltpu


def _make_gate_kernel(dim_a, unroll_conv):
    def kernel(x_ref, a_ref, w_ref, b_ref, o_ref):
        # x_ref: (dim,   t_hw)   gated input tile (native dtype)
        # a_ref: (dim_a, t_hw)   activation tile  (native dtype)
        # w_ref: (dim, dim_a)    1x1 conv weight, f32
        # b_ref: (dim, 1)        conv bias, f32
        # o_ref: (dim,   t_hw)   output tile
        a = jnp.maximum(a_ref[...], 0)            # ReLU, stays in input dtype
        w = w_ref[...]                            # f32
        if unroll_conv:
            # Tiny contraction: dim_a broadcasted FMAs on the VPU
            # (outer products), f32 accumulation via dtype promotion.
            acc = w[:, 0:1] * a[0:1, :]
            for c in range(1, dim_a):
                acc = acc + w[:, c:c + 1] * a[c:c + 1, :]
        else:
            acc = jnp.dot(w, a.astype(jnp.float32),
                          preferred_element_type=jnp.float32)
        g = jax.nn.sigmoid(acc + b_ref[...])      # f32, lane-dense
        o_ref[...] = (x_ref[...] * g).astype(o_ref.dtype)

    return kernel


def gate_block_pallas(x, a, weight, bias, *, max_hw_tile=8192,
                      vmem_budget_bytes=24 * 1024 * 1024):
    """
    x:      (B, dim,   H, W)  NCHW
    a:      (B, dim_a, H, W)  NCHW
    weight: (dim, dim_a)      (PyTorch Conv2d 1x1 weight, squeezed)
    bias:   (dim,)
    returns (B, dim, H, W)    NCHW
    """
    B, dim, H, W = x.shape
    _, dim_a, Ha, Wa = a.shape
    assert (Ha, Wa) == (H, W)
    HW = H * W

    # NCHW -> (B, C, H*W): a pure reshape (no HBM copy); H*W lands on lanes.
    x3 = x.reshape(B, dim, HW)
    a3 = a.reshape(B, dim_a, HW)

    # Conv parameters stay f32 (never quantized to the activation dtype).
    w = weight.astype(jnp.float32)                     # (dim, dim_a)
    b = bias.astype(jnp.float32).reshape(dim, 1)       # (dim, 1)

    # Pick the HW tile: as large as the double-buffered VMEM budget allows,
    # a multiple of 128 lanes, capped at max_hw_tile.  If the whole spatial
    # row fits, use it directly (full-extent blocks are always legal).
    itemsize = x.dtype.itemsize
    bytes_per_col = (2 * dim + dim_a) * itemsize       # x + out + a, per lane
    cols_budget = vmem_budget_bytes // (2 * bytes_per_col)   # /2: dbl buffer
    t_hw = max(128, min(max_hw_tile, (cols_budget // 128) * 128))
    if HW <= t_hw:
        t_hw = HW
    n_hw = pl.cdiv(HW, t_hw)

    unroll_conv = dim_a <= 8
    kernel = _make_gate_kernel(dim_a, unroll_conv)

    cost = pl.CostEstimate(
        flops=2 * B * HW * dim * dim_a,
        transcendentals=B * HW * dim,                        # sigmoid
        bytes_accessed=(2 * dim + dim_a) * B * HW * itemsize)

    out3 = pl.pallas_call(
        kernel,
        out_shape=jax.ShapeDtypeStruct((B, dim, HW), x.dtype),
        grid_spec=pltpu.PrefetchScalarGridSpec(
            num_scalar_prefetch=0,
            grid=(B, n_hw),
            in_specs=[
                pl.BlockSpec((None, dim, t_hw), lambda bi, j: (bi, 0, j)),
                pl.BlockSpec((None, dim_a, t_hw), lambda bi, j: (bi, 0, j)),
                pl.BlockSpec((dim, dim_a), lambda bi, j: (0, 0)),
                pl.BlockSpec((dim, 1), lambda bi, j: (0, 0)),
            ],
            out_specs=pl.BlockSpec((None, dim, t_hw), lambda bi, j: (bi, 0, j)),
        ),
        compiler_params=pltpu.CompilerParams(
            dimension_semantics=("parallel", "parallel"),
            vmem_limit_bytes=32 * 1024 * 1024),
        cost_estimate=cost,
    )(x3, a3, w, b)

    return out3.reshape(B, dim, H, W)


if __name__ == "__main__":
    key = jax.random.PRNGKey(0)
    B, dim, dim_a, H, Wd = 2, 8, 4, 16, 16

    k1, k2, k3, k4 = jax.random.split(key, 4)
    x = jax.random.normal(k1, (B, dim, H, Wd), dtype=jnp.float32)
    a = jax.random.normal(k2, (B, dim_a, H, Wd), dtype=jnp.float32)
    # Deterministic synthetic conv params (Conv2d(dim_a, dim, kernel_size=1)).
    weight = jax.random.normal(k3, (dim, dim_a), dtype=jnp.float32) * 0.1
    bias = jax.random.normal(k4, (dim,), dtype=jnp.float32) * 0.1

    out = gate_block_pallas(x, a, weight, bias)
    out = jax.block_until_ready(out)

    # Reference in plain JAX to sanity-check semantics.
    a_relu = jnp.maximum(a, 0.0)
    g_ref = jax.nn.sigmoid(
        jnp.einsum("oc,bchw->bohw", weight, a_relu) + bias[None, :, None, None])
    ref = x * g_ref
    assert out.shape == (B, dim, H, Wd)
    assert jnp.allclose(out, ref, atol=1e-5, rtol=1e-5)

    print("KERNEL_OK")
</pallas_src>

<mosaic_0001>
module attributes {stable_mosaic.version = 11 : i64} {
  func.func @kernel(%arg0: i32, %arg1: i32, %arg2: memref<1x8x256xf32, #tpu.memory_space<vmem>>, %arg3: memref<1x4x256xf32, #tpu.memory_space<vmem>>, %arg4: memref<8x4xf32, #tpu.memory_space<vmem>>, %arg5: memref<8x1xf32, #tpu.memory_space<vmem>>, %arg6: memref<1x8x256xf32, #tpu.memory_space<vmem>>) attributes {dimension_semantics = [#tpu.dimension_semantics<parallel>, #tpu.dimension_semantics<parallel>], iteration_bounds = array<i64: 2, 1>, scalar_prefetch = 0 : i64, scratch_operands = 0 : i64, tpu.core_type = #tpu.core_type<tc>, window_params = [{transform_indices = @transform_0, window_bounds = array<i64: 1, 8, 256>}, {transform_indices = @transform_1, window_bounds = array<i64: 1, 4, 256>}, {pipeline_mode = #tpu.pipeline_mode<synchronous>, transform_indices = @transform_2, window_bounds = array<i64: 8, 4>}, {pipeline_mode = #tpu.pipeline_mode<synchronous>, transform_indices = @transform_3, window_bounds = array<i64: 8, 1>}, {transform_indices = @transform_4, window_bounds = array<i64: 1, 8, 256>}]} {
    %c0 = arith.constant 0 : index
    %c0_0 = arith.constant 0 : index
    %c0_1 = arith.constant 0 : index
    %0 = vector.load %arg3[%c0, %c0_0, %c0_1] : memref<1x4x256xf32, #tpu.memory_space<vmem>>, vector<1x4x256xf32>
    %1 = vector.shape_cast %0 : vector<1x4x256xf32> to vector<4x256xf32>
    %cst = arith.constant 0.000000e+00 : f32
    %2 = vector.broadcast %cst : f32 to vector<4x256xf32>
    %3 = arith.maximumf %1, %2 : vector<4x256xf32>
    %c0_2 = arith.constant 0 : index
    %c0_3 = arith.constant 0 : index
    %4 = vector.load %arg4[%c0_2, %c0_3] : memref<8x4xf32, #tpu.memory_space<vmem>>, vector<8x4xf32>
    %5 = vector.extract_strided_slice %4 {offsets = [0, 0], sizes = [8, 1], strides = [1, 1]} : vector<8x4xf32> to vector<8x1xf32>
    %6 = vector.extract_strided_slice %3 {offsets = [0, 0], sizes = [1, 256], strides = [1, 1]} : vector<4x256xf32> to vector<1x256xf32>
    %7 = vector.broadcast %5 : vector<8x1xf32> to vector<8x256xf32>
    %8 = vector.broadcast %6 : vector<1x256xf32> to vector<8x256xf32>
    %9 = arith.mulf %7, %8 : vector<8x256xf32>
    %10 = vector.extract_strided_slice %4 {offsets = [0, 1], sizes = [8, 1], strides = [1, 1]} : vector<8x4xf32> to vector<8x1xf32>
    %11 = vector.extract_strided_slice %3 {offsets = [1, 0], sizes = [1, 256], strides = [1, 1]} : vector<4x256xf32> to vector<1x256xf32>
    %12 = vector.broadcast %10 : vector<8x1xf32> to vector<8x256xf32>
    %13 = vector.broadcast %11 : vector<1x256xf32> to vector<8x256xf32>
    %14 = arith.mulf %12, %13 : vector<8x256xf32>
    %15 = arith.addf %9, %14 : vector<8x256xf32>
    %16 = vector.extract_strided_slice %4 {offsets = [0, 2], sizes = [8, 1], strides = [1, 1]} : vector<8x4xf32> to vector<8x1xf32>
    %17 = vector.extract_strided_slice %3 {offsets = [2, 0], sizes = [1, 256], strides = [1, 1]} : vector<4x256xf32> to vector<1x256xf32>
    %18 = vector.broadcast %16 : vector<8x1xf32> to vector<8x256xf32>
    %19 = vector.broadcast %17 : vector<1x256xf32> to vector<8x256xf32>
    %20 = arith.mulf %18, %19 : vector<8x256xf32>
    %21 = arith.addf %15, %20 : vector<8x256xf32>
    %22 = vector.extract_strided_slice %4 {offsets = [0, 3], sizes = [8, 1], strides = [1, 1]} : vector<8x4xf32> to vector<8x1xf32>
    %23 = vector.extract_strided_slice %3 {offsets = [3, 0], sizes = [1, 256], strides = [1, 1]} : vector<4x256xf32> to vector<1x256xf32>
    %24 = vector.broadcast %22 : vector<8x1xf32> to vector<8x256xf32>
    %25 = vector.broadcast %23 : vector<1x256xf32> to vector<8x256xf32>
    %26 = arith.mulf %24, %25 : vector<8x256xf32>
    %27 = arith.addf %21, %26 : vector<8x256xf32>
    %c0_4 = arith.constant 0 : index
    %c0_5 = arith.constant 0 : index
    %28 = vector.load %arg5[%c0_4, %c0_5] : memref<8x1xf32, #tpu.memory_space<vmem>>, vector<8x1xf32>
    %29 = vector.broadcast %28 : vector<8x1xf32> to vector<8x256xf32>
    %30 = arith.addf %27, %29 : vector<8x256xf32>
    %31 = arith.negf %30 : vector<8x256xf32>
    %32 = math.exp %31 : vector<8x256xf32>
    %cst_6 = arith.constant 1.000000e+00 : f32
    %33 = vector.broadcast %cst_6 : f32 to vector<8x256xf32>
    %34 = arith.addf %33, %32 : vector<8x256xf32>
    %35 = arith.divf %33, %34 : vector<8x256xf32>
    %c0_7 = arith.constant 0 : index
    %c0_8 = arith.constant 0 : index
    %c0_9 = arith.constant 0 : index
    %36 = vector.load %arg2[%c0_7, %c0_8, %c0_9] : memref<1x8x256xf32, #tpu.memory_space<vmem>>, vector<1x8x256xf32>
    %37 = vector.shape_cast %36 : vector<1x8x256xf32> to vector<8x256xf32>
    %38 = arith.mulf %37, %35 : vector<8x256xf32>
    %c0_10 = arith.constant 0 : index
    %c0_11 = arith.constant 0 : index
    %c0_12 = arith.constant 0 : index
    %39 = vector.load %arg6[%c0_10, %c0_11, %c0_12] : memref<1x8x256xf32, #tpu.memory_space<vmem>>, vector<1x8x256xf32>
    %40 = vector.shape_cast %39 : vector<1x8x256xf32> to vector<8x256xf32>
    %41 = vector.shape_cast %38 : vector<8x256xf32> to vector<1x8x256xf32>
    tpu.vector_store %arg6[%c0_10, %c0_11, %c0_12], %41 {strides = array<i32>} : memref<1x8x256xf32, #tpu.memory_space<vmem>>, vector<1x8x256xf32>,
    return
  }
  func.func @transform_0(%arg0: i32, %arg1: i32) -> (i32, i32, i32) {
    %c0_i32 = arith.constant 0 : i32
    %c0_i32_0 = arith.constant 0 : i32
    return %arg0, %c0_i32, %arg1 : i32, i32, i32
  }
  func.func @transform_1(%arg0: i32, %arg1: i32) -> (i32, i32, i32) {
    %c0_i32 = arith.constant 0 : i32
    %c0_i32_0 = arith.constant 0 : i32
    return %arg0, %c0_i32, %arg1 : i32, i32, i32
  }
  func.func @transform_2(%arg0: i32, %arg1: i32) -> (i32, i32) {
    %c0_i32 = arith.constant 0 : i32
    %c0_i32_0 = arith.constant 0 : i32
    %c0_i32_1 = arith.constant 0 : i32
    return %c0_i32, %c0_i32_0 : i32, i32
  }
  func.func @transform_3(%arg0: i32, %arg1: i32) -> (i32, i32) {
    %c0_i32 = arith.constant 0 : i32
    %c0_i32_0 = arith.constant 0 : i32
    %c0_i32_1 = arith.constant 0 : i32
    return %c0_i32, %c0_i32_0 : i32, i32
  }
  func.func @transform_4(%arg0: i32, %arg1: i32) -> (i32, i32, i32) {
    %c0_i32 = arith.constant 0 : i32
    %c0_i32_0 = arith.constant 0 : i32
    return %arg0, %c0_i32, %arg1 : i32, i32, i32
  }
}

</mosaic_0001>

<bundles_post_ra>
// kernel: tpu_custom_call.1
= control target key start
LH: loop header
LB: loop body
LE: loop exit
PB: predicated region body
PF: predicated region fallthrough
CT: control target
= control target key end

     0   :  { %9 = vsyncpa [#allocation3], 0  ;;  %s960_s0 = inlined_call_operand.hbm [shape: f32[2,8,256], index: 0, kind: input, shape index: {}]   ;;  %s961_s1 = inlined_call_operand.vmem [shape: f32[2,4,256], index: 1, kind: input, shape index: {}]   ;;  %s962_s2 = inlined_call_operand.vmem [shape: f32[8,4], index: 2, kind: input, shape index: {}]   ;;  %s963_s3 = inlined_call_operand.vmem [shape: f32[8,1], index: 3, kind: input, shape index: {}]   ;;  %s964_s4 = inlined_call_operand.hbm [shape: f32[2,8,256], index: 4, kind: output, shape index: {}]  }
   0x1   :  { %11 = vsyncpa [#allocation3 + $0x1], 0 }
   0x2   :  { %12 = vsyncpa [#allocation4], 0 }
   0x3   :  { %14 = vsyncpa [#allocation4 + $0x1], 0  ;;  %s769_s15 = smov 0   ;;  %s771_s16 = smov 0  }
   0x4   :  { %s773_s17 = smov 0   ;;  %s775_s18 = smov 0  }
   0x5   :  { %s777_s19 = smov 0   ;;  %s779_s20 = smov 0  }
   0x6 LB: > { %s522_s21 = sadd.s32 4294967295, %s736_s20   ;;  %s523_s22 = sadd.s32 4294967294, %s736_s20   ;;  %s736_s20 = sphi %s779_s20, %s20_s20   ;;  %s732_s19 = sphi %s777_s19, %s980_s19   ;;  %s728_s18 = sphi %s775_s18, %s979_s18   ;;  %s724_s17 = sphi %s773_s17, %s978_s17   ;;  %s720_s16 = sphi %s771_s16, %s977_s16   ;;  %s716_s15 = sphi %s769_s15, %s976_s15  }
   0x7   : > { %s32_s23 = sadd.s32 1, %s732_s19  ;;  %s41_s24 = sadd.s32 1, %s724_s17 }
   0x8   : > { %p34_p0 = scmp.ge.s32.totalorder %s32_s23, 2  ;;  %p48_p1 = scmp.ne.s32.totalorder %s724_s17, %s720_s16 }
   0x9   : > { %p49_p2 = scmp.eq.s32.totalorder %s736_s20, 0  ;;  %p54_p3 = scmp.ne.s32.totalorder %s720_s16, %s716_s15 }
   0xa   : > { %s982_s23 = smov (%p34_p0, %s32_s23), 0  ;;  %p55_p5 = scmp.eq.s32.totalorder %s522_s21, 0 }
   0xb   : > { %p810_p4 = por %p49_p2, %p48_p1  ;;  %s36_s26 = ssub.s32 %s732_s19, %s982_s23 }
   0xc   : > { %p150_p6 = scmp.eq.s32.totalorder %s522_s21, 1  ;;  %p39_p7 = scmp.eq.s32.totalorder %s36_s26, 0 }
   0xd   : > { %p816_p8 = por %p55_p5, %p54_p3  ;;  %p156_p10 = scmp.eq.s32.totalorder %s523_s22, 1 }
   0xe   : > { %p820_p9 = por %p150_p6, %p48_p1  ;;  %p556_p13 = scmp.lt.s32.totalorder %s736_s20, 2 }
   0xf   : > { %s825_s29 = scalar_select %p39_p7, %s724_s17, %s41_s24  }
  0x10   : > { %s968_s28 = scalar_select %p820_p9, 1, 0 }
  0x11   : > { %p827_p11 = por %p156_p10, %p54_p3  ;;  %s182_s5 = sand.u32 1, %s724_s17  }
  0x12   : > { %s526_s6 = sshll.u32 %s182_s5, 4  ;;  %s541_s7 = sshll.u32 %s732_s19, 8 }
  0x13   : > { %s969_s30 = scalar_select %p827_p11, 1, 0 }
  0x14   : > { %s838_s10 = scalar_lea.hbm %s960_s0, %s541_s7  ;;  %s186_s11 = scalar_lea.vmem [#allocation2], %s526_s6 }
  0x15   : > { %s196_s12 = sshll.u32 %s186_s11, 4  ;;  %p844_p0 = pnand %p556_p13, %p810_p4  ;;  %s840_s12 = int_to_ptr.vmem [resolvable:$true] %s196_s12 }
  0x16   : > { %s183_s14 = scalar_lea.sflag [#allocation3], %s182_s5  ;;  %s624_s21 = scalar_lea.hbm %s838_s10, 256 }
  0x17   : > { %p625_p3 = scmp.ne.s32.totalorder %s838_s10, %s624_s21  ;;  %p626_p5 = pneg %p844_p0 }
  0x18   : > { %s629_s25 = scalar_lea.hbm %s960_s0, 512  ;;  %p630_p4 = scmp.lt.u32.totalorder %s838_s10, %s960_s0 }
  0x19   : > { %p627_p6 = pnand %p626_p5, %p625_p3  ;;  %p631_p10 = scmp.lt.u32.totalorder %s629_s25, %s624_s21 }
  0x1a   : > { %p633_p12 = scmp.lt.u32.totalorder %s624_s21, %s838_s10 }
  0x1b   : > { %p628_p7 = pneg %p627_p6  ;;  %p632_p13 = por %p631_p10, %p630_p4 }
  0x1d   : > { %p634_p1 = por %p633_p12, %p632_p13 }
  0x1f   : > { %p635_p2 = pnand %p634_p1, %p628_p7 }
  0x21   : > { %638 = shalt.err (!%p635_p2)
}
  0x22   : > { %s639_s5 = scalar_lea.vmem %s840_s12, 256  ;;  %s738_s7 = smov [#allocation2]  }
  0x23   : > { %p640_p3 = scmp.ne.s32.totalorder %s840_s12, %s639_s5  ;;  %s644_s8 = sshll.u32 %s738_s7, 4  ;;  %s645_s8 = int_to_ptr.vmem [resolvable:$false] %s644_s8 }
  0x24   : > { %s646_s9 = scalar_lea.vmem %s645_s8, 512  ;;  %p647_p9 = scmp.lt.s32.totalorder %s840_s12, %s645_s8 }
  0x25   : > { %p642_p6 = pnand %p640_p3, %p626_p5  ;;  %p648_p4 = scmp.lt.s32.totalorder %s646_s9, %s639_s5 }
  0x27   : > { %p643_p11 = pneg %p642_p6  ;;  %p649_p10 = por %p648_p4, %p647_p9 }
  0x29   : > { %p650_p12 = pnand %p649_p10, %p643_p11 }
  0x2b   : > { %653 = shalt.err (!%p650_p12)
}
  0x2c   : > { %551 = dma.hbm_to_vmem [thread:$0]  (!%p844_p0), %s838_s10, 256, %s840_s12, %s183_s14  }
  0x2d   : > { %p971_p1 = scmp.lt.s32.totalorder %s736_s20, 3  ;;  %p972_p2 = scmp.ge.s32.totalorder %s736_s20, 1 }
  0x2f   : > { %p215_p5 = pnand %p972_p2, %p971_p1 }
  0x30   : > { %s880_s11 = sand.u32 (!%p215_p5), 1, %s720_s16  }
  0x31   : > { %218 = sbr.rel (%p215_p5) target bundleno = 245 (0xf5), region = 36  ;;  %s530_s21 = sshll.u32 (!%p215_p5), %s880_s11, 4 }
  0x32   : > { %s221_s22 = scalar_lea.sflag (!%p215_p5), [#allocation3], %s880_s11  ;;  %s886_s13 = scalar_lea.vmem (!%p215_p5), [#allocation2], %s530_s21 }
  0x38   : > { %707 = dma.done.wait (%p816_p8), %s221_s22, 256  }
  0x39   : > { %709 = vsyncadd (%p816_p8), %s221_s22, 4294967040  ;;  %v739_v0 = vmov 0   ;;  %v740_v1 = vmov 2   ;;  %v272_v2 = vld [vmem:[%s962_s2] sm:$0xff]  ;;  %v741_v3 = vmov 1   ;;  %v742_v4 = vmov 3  }
  0x3a   : > { %610 = vset.pattern.permute.xlu0 %v739_v0  ;;  %612 = vset.pattern.permute.xlu1 %v740_v1  ;;  %v377_v5 = vld [vmem:[%s963_s3] sm:$0xff]  ;;  %p260_p8 = scmp.lt.s32.totalorder %s728_s18, 1  ;;  %v279_v6 = vlaneseq  ;;  %v398_v62 = vld [vmem:[%s886_s13 + $0x8] sm:$0xff]  ;;  %s543_s7 = sshll.u32 %s728_s18, 8 }
  0x3b   : > { %275 = vperm.xlu0 %610, %v272_v2   ;;  %326 = vperm.xlu1 %612, %v272_v2   ;;  %v397_v61 = vld [vmem:[%s886_s13] sm:$0xff]  ;;  %s257_s8 = scalar_lea.vmem [#allocation5], %s530_s21  ;;  %s911_s12 = scalar_lea.hbm %s964_s4, %s543_s7 }
  0x3c   : > { %s261_s24 = scalar_select %p260_p8, %s728_s18, 1  ;;  %v280_v7 = vshrl.u32 %v279_v6, 7 }
  0x3d   : > { %s420_s9 = sshll.u32 %s257_s8, 4  ;;  %s404_s18 = scalar_lea.sflag [#allocation4], %s880_s11  ;;  %s913_s9 = int_to_ptr.vmem [resolvable:$true] %s420_s9 }
  0x3e   : > { %s542_s25 = sshll.u32 %s261_s24, 3  ;;  %v281_v9 = vsub.s32 0, %v280_v7  ;;  %v285_v10 = vsub.s32 4, %v280_v7  ;;  %v305_v12 = vsub.s32 1, %v280_v7  ;;  %v309_v13 = vsub.s32 5, %v280_v7  ;;  %s654_s13 = scalar_lea.vmem %s913_s9, 256 }
  0x3f   : > { %611 = vset.pattern.permute.xlu0 %v741_v3  ;;  %613 = vset.pattern.permute.xlu1 %v742_v4  ;;  %s267_s5 = scalar_lea.vmem %s961_s1, %s542_s25  ;;  %v331_v14 = vsub.s32 2, %v280_v7  ;;  %v335_v15 = vsub.s32 6, %v280_v7  ;;  %v357_v16 = vsub.s32 3, %v280_v7  ;;  %v361_v17 = vsub.s32 7, %v280_v7  ;;  %p655_p9 = scmp.ne.s32.totalorder %s913_s9, %s654_s13 }
  0x40   : > { %300 = vperm.xlu0 %611, %v272_v2   ;;  %352 = vperm.xlu1 %613, %v272_v2   ;;  %v270_v8 = vld [vmem:[%s267_s5] sm:$0xff]  ;;  %p973_p11 = scmp.ne.s32.totalorder %s968_s28, 0  ;;  %s743_s21 = smov [#allocation5]  }
  0x41   : > { %v271_v11 = vmax.f32 %v270_v8, 0.0  ;;  %s658_s27 = sshll.u32 %s743_s21, 4  ;;  %s659_s27 = int_to_ptr.vmem [resolvable:$false] %s658_s27 }
  0x42   : > { %p656_p0 = pnand %p655_p9, %p973_p11  ;;  %s660_s14 = scalar_lea.vmem %s659_s27, 512 }
  0x43   : > { %v282_v18 = vrot.slane %v271_v11, %v281_v9  ;;  %v286_v19 = vrot.slane %v271_v11, %v285_v10  ;;  %v306_v20 = vrot.slane %v271_v11, %v305_v12  ;;  %v310_v21 = vrot.slane %v271_v11, %v309_v13  ;;  %p661_p13 = scmp.lt.s32.totalorder %s913_s9, %s659_s27  ;;  %p662_p3 = scmp.lt.s32.totalorder %s660_s14, %s654_s13 }
  0x44   : > { %614 = vset.pattern.permute.xlu1 %v739_v0  ;;  %615 = vset.pattern.permute.xlu0 %v739_v0  ;;  %v332_v22 = vrot.slane %v271_v11, %v331_v14  ;;  %v336_v23 = vrot.slane %v271_v11, %v335_v15  ;;  %v358_v26 = vrot.slane %v271_v11, %v357_v16  ;;  %p657_p7 = pneg %p656_p0 }
  0x45   : > { %380 = vperm.xlu1 %614, %v377_v5   ;;  %v362_v27 = vrot.slane %v271_v11, %v361_v17  ;;  %v292_v28 = vrot.slane %v282_v18, %v281_v9  ;;  %v296_v29 = vrot.slane %v286_v19, %v281_v9  ;;  %v316_v30 = vrot.slane %v306_v20, %v305_v12  ;;  %p663_p6 = por %p662_p3, %p661_p13 }
  0x46   : > { %v320_v31 = vrot.slane %v310_v21, %v305_v12  ;;  %v342_v32 = vrot.slane %v332_v22, %v331_v14  ;;  %v346_v33 = vrot.slane %v336_v23, %v331_v14  ;;  %v368_v34 = vrot.slane %v358_v26, %v357_v16 }
  0x47   : > { %v372_v35 = vrot.slane %v362_v27, %v357_v16  ;;  %p664_p4 = pnand %p663_p6, %p657_p7 }
  0xba   : > { %v276_v24 = vpop.permute.xlu0 %275  ;;  %v327_v25 = vpop.permute.xlu1 %326 }
  0xbb   : > { %v297_v38 = vmul.f32 %v292_v28, %v276_v24  ;;  %v298_v39 = vmul.f32 %v296_v29, %v276_v24  ;;  %v347_v42 = vmul.f32 %v342_v32, %v327_v25  ;;  %v348_v43 = vmul.f32 %v346_v33, %v327_v25 }
  0xbf   : > { %v301_v36 = vpop.permute.xlu0 %300  ;;  %v353_v37 = vpop.permute.xlu1 %352 }
  0xc0   : > { %v321_v40 = vmul.f32 %v316_v30, %v301_v36  ;;  %v322_v41 = vmul.f32 %v320_v31, %v301_v36  ;;  %v373_v46 = vmul.f32 %v368_v34, %v353_v37  ;;  %v374_v47 = vmul.f32 %v372_v35, %v353_v37 }
  0xc2   : > { %v323_v44 = vadd.f32 %v321_v40, %v297_v38  ;;  %v324_v45 = vadd.f32 %v322_v41, %v298_v39 }
  0xc4   : > { %v349_v48 = vadd.f32 %v347_v42, %v323_v44  ;;  %v350_v49 = vadd.f32 %v348_v43, %v324_v45  ;;  %v381_v50 = vpop.permute.xlu1 %380 }
  0xc6   : > { %v375_v51 = vadd.f32 %v373_v46, %v349_v48  ;;  %v376_v52 = vadd.f32 %v374_v47, %v350_v49 }
  0xc8   : > { %v383_v53 = vadd.f32 %v381_v50, %v375_v51  ;;  %v384_v54 = vadd.f32 %v381_v50, %v376_v52 }
  0xca   : > { %v534_v55 = vmul.f32 -1.442695, %v383_v53  ;;  %v535_v56 = vmul.f32 -1.442695, %v384_v54 }
  0xcc   : > { %616 = vpow2.f32 %v534_v55 }
  0xcd   : > { %618 = vpow2.f32 %v535_v56 }
  0xd6   : > { %v617_v57 = vpop.eup %616 }
  0xd7   : > { %v619_v58 = vpop.eup %618  ;;  %v391_v59 = vadd.f32 1.0, %v617_v57 }
  0xd8   : > { %v392_v60 = vadd.f32 1.0, %v619_v58 }
  0xd9   : > { %620 = vrcp.f32 %v391_v59 }
  0xda   : > { %622 = vrcp.f32 %v392_v60 }
  0xe3   : > { %v621_v63 = vpop.eup %620 }
  0xe4   : > { %v623_v0 = vpop.eup %622  ;;  %v399_v1 = vmul.f32 %v621_v63, %v397_v61 }
  0xe5   : > { %v400_v2 = vmul.f32 %v623_v0, %v398_v62 }
  0xe6   : > { %401 = vst [vmem:[%s257_s8] sm:$0xff] %v399_v1 }
  0xe7   : > { %402 = vst [vmem:[%s257_s8 + $0x8] sm:$0xff] %v400_v2 }
  0xe8   : > { %667 = shalt.err (!%p664_p4)
}
  0xe9   : > { %s668_s11 = scalar_lea.hbm %s911_s12, 256  ;;  %s672_s26 = scalar_lea.hbm %s964_s4, 512 }
  0xea   : > { %p669_p10 = scmp.ne.s32.totalorder %s911_s12, %s668_s11  ;;  %p673_p2 = scmp.lt.u32.totalorder %s911_s12, %s964_s4 }
  0xeb   : > { %p674_p5 = scmp.lt.u32.totalorder %s672_s26, %s668_s11  ;;  %p676_p9 = scmp.lt.u32.totalorder %s668_s11, %s911_s12 }
  0xec   : > { %p670_p12 = pnand %p669_p10, %p973_p11 }
  0xed   : > { %p675_p8 = por %p674_p5, %p673_p2 }
  0xee   : > { %p671_p1 = pneg %p670_p12 }
  0xef   : > { %p677_p0 = por %p676_p9, %p675_p8 }
  0xf1   : > { %p678_p7 = pnand %p677_p0, %p671_p1 }
  0xf3   : > { %681 = shalt.err (!%p678_p7)
}
  0xf4   : > { %546 = dma.vmem_to_hbm [thread:$0]  (%p973_p11), %s913_s9, 256, %s911_s12, %s404_s18  }
  0xf5 PF: > { %s432_s7 = sand.u32 1, %s716_s15   ;;  %p974_p13 = scmp.ne.s32.totalorder %s969_s30, 0 }
  0xf6   : > { %p975_p3 = scmp.ge.s32.totalorder %s736_s20, 2  ;;  %s433_s8 = scalar_lea.sflag [#allocation4], %s432_s7 }
  0xf8   : > { %p553_p6 = pnand %p975_p3, %p974_p13 }
  0xfa   : > { %711 = dma.done.wait (!%p553_p6), %s433_s8, 256  }
  0xfb   : > { %713 = vsyncadd (!%p553_p6), %s433_s8, 4294967040  ;;  %s20_s20 = sadd.s32 1, %s736_s20   ;;  %s976_s15 = smov %s720_s16 }
  0xfc   : > { %p17_p4 = scmp.ge.s32.totalorder %s20_s20, 4   ;;  %s977_s16 = smov %s724_s17 }
  0xfd   : > { %s978_s17 = smov %s825_s29  ;;  %s979_s18 = smov %s732_s19 }
  0xfe   : > { %s980_s19 = smov %s982_s23  ;;  %19 = sbr.rel (!%p17_p4) target bundleno = 6 (0x6), region = 84 }
 0x105   :  { %438 = vsyncpa [#allocation3], 1 }
 0x106   :  { %440 = vsyncpa [#allocation3 + $0x1], 1 }
 0x107   :  { %441 = vsyncpa [#allocation4], 1 }
 0x108   :  { %443 = vsyncpa [#allocation4 + $0x1], 1 }

</bundles_post_ra>
